<compile_context>
chip_gen: v7x
topology: tpu7x:2x2x1
jax: 0.10.0
libtpu: 0.0.40
codegen_flags: <defaults>
</compile_context>

<pallas_src>
import numpy as np
import jax
import jax.numpy as jnp
from jax.experimental import pallas as pl
from jax.experimental.pallas import tpu as pltpu


def _make_pe(d_model: int, max_seq_length: int) -> jnp.ndarray:
    """Vectorized replica of the PyTorch double loop building the pe buffer."""
    pos = np.arange(max_seq_length, dtype=np.float64)[:, None]
    i = np.arange(d_model)[None, :]
    # even i: sin(pos / 10000**(i/d));  odd i: cos(pos / 10000**((i-1)/d))
    # both exponents equal 2*(i//2)/d.
    exponent = (2 * (i // 2)) / d_model
    angle = pos / np.power(10000.0, exponent)
    pe = np.where(i % 2 == 0, np.sin(angle), np.cos(angle)).astype(np.float32)
    return jnp.asarray(pe)[None, :, :]  # (1, max_seq_length, d_model)


def _pos_enc_kernel(x_ref, pe_ref, o_ref):
    # x_ref:  (TB, S,   D)  batch tile of patch tokens
    # pe_ref: (1,  S+1, D)  positional encoding with cls token folded into row 0
    # o_ref:  (TB, S+1, D)  output tile
    tb, seq, d = x_ref.shape
    # Row 0 of every batch element: pe_cls[0] (= cls_token + pe[0]).
    o_ref[:, 0:1, :] = jnp.broadcast_to(pe_ref[:, 0:1, :], (tb, 1, d))
    # Rows 1..S: x + pe[1:].  pe broadcasts over the batch tile.
    o_ref[:, pl.ds(1, seq), :] = x_ref[...] + pe_ref[:, pl.ds(1, seq), :]


def _pick_batch_block(batch: int, seq: int, d_model: int, itemsize: int,
                      vmem_budget_bytes: int = 8 * 1024 * 1024) -> int:
    """Largest batch tile whose double-buffered in+out blocks fit the budget,
    preferring a grid of >= 2 steps (so v7x can use both TensorCores)."""
    per_b = (seq + (seq + 1)) * d_model * itemsize * 2  # in + out, x2 buffers
    cap = max(1, vmem_budget_bytes // max(per_b, 1))
    divisors = [t for t in range(1, batch + 1) if batch % t == 0 and t <= cap]
    multi = [t for t in divisors if batch // t >= 2]
    return max(multi) if multi else max(divisors)


def positional_encoding(x: jnp.ndarray, cls_token: jnp.ndarray,
                        pe: jnp.ndarray) -> jnp.ndarray:
    """x: (B, S, D), cls_token: (1, 1, D), pe: (1, S+1, D) -> (B, S+1, D)."""
    B, S, D = x.shape
    assert cls_token.shape == (1, 1, D)
    assert pe.shape == (1, S + 1, D)

    # Fold the cls token into pe row 0 (tiny one-time XLA op), match x's dtype
    # (run everything in bf16 if the surrounding model does).
    pe_cls = (pe.astype(jnp.float32)
                .at[0, 0, :].add(cls_token[0, 0, :].astype(jnp.float32))
                .astype(x.dtype))

    itemsize = jnp.dtype(x.dtype).itemsize
    tb = _pick_batch_block(B, S, D, itemsize)
    grid = (B // tb,)

    cost = pl.CostEstimate(
        flops=B * (S + 1) * D,
        transcendentals=0,
        bytes_accessed=2 * B * (S + 1) * D * itemsize)

    return pl.pallas_call(
        _pos_enc_kernel,
        out_shape=jax.ShapeDtypeStruct((B, S + 1, D), x.dtype),
        grid_spec=pltpu.PrefetchScalarGridSpec(
            num_scalar_prefetch=0,
            grid=grid,
            in_specs=[
                pl.BlockSpec((tb, S, D), lambda b: (b, 0, 0)),      # x
                pl.BlockSpec((1, S + 1, D), lambda b: (0, 0, 0)),   # pe_cls
            ],
            out_specs=pl.BlockSpec((tb, S + 1, D), lambda b: (b, 0, 0)),
        ),
        compiler_params=pltpu.CompilerParams(
            dimension_semantics=("parallel",),
            vmem_limit_bytes=32 * 1024 * 1024),
        cost_estimate=cost,
    )(x, pe_cls)


if __name__ == "__main__":
    # Small shapes consistent with the module: d_model=32, seq=8
    # => max_seq_length = seq + 1 = 9 (required so concat(x, cls) + pe works).
    B, S, D = 2, 8, 32
    max_seq_length = S + 1

    key = jax.random.PRNGKey(0)
    k_x, k_cls = jax.random.split(key)
    x = jax.random.normal(k_x, (B, S, D), dtype=jnp.float32)
    cls_token = jax.random.normal(k_cls, (1, 1, D), dtype=jnp.float32)
    pe = _make_pe(D, max_seq_length)

    out = positional_encoding(x, cls_token, pe)
    out = jax.block_until_ready(out)

    # Reference check in plain JAX (same math as the PyTorch forward).
    tokens_batch = jnp.broadcast_to(cls_token, (B, 1, D))
    ref = jnp.concatenate([tokens_batch, x], axis=1) + pe
    assert out.shape == (B, max_seq_length, D)
    np.testing.assert_allclose(np.asarray(out), np.asarray(ref),
                               rtol=1e-6, atol=1e-6)

    print("KERNEL_OK")
</pallas_src>

<mosaic_0001>
module attributes {stable_mosaic.version = 11 : i64} {
  func.func @_pos_enc_kernel(%arg0: i32, %arg1: memref<1x8x32xf32, #tpu.memory_space<vmem>>, %arg2: memref<1x9x32xf32, #tpu.memory_space<vmem>>, %arg3: memref<1x9x32xf32, #tpu.memory_space<vmem>>) attributes {dimension_semantics = [#tpu.dimension_semantics<parallel>], iteration_bounds = array<i64: 2>, scalar_prefetch = 0 : i64, scratch_operands = 0 : i64, tpu.core_type = #tpu.core_type<tc>, window_params = [{transform_indices = @transform_0, window_bounds = array<i64: 1, 8, 32>}, {pipeline_mode = #tpu.pipeline_mode<synchronous>, transform_indices = @transform_1, window_bounds = array<i64: 1, 9, 32>}, {transform_indices = @transform_2, window_bounds = array<i64: 1, 9, 32>}]} {
    %c0 = arith.constant 0 : index
    %c0_0 = arith.constant 0 : index
    %c0_1 = arith.constant 0 : index
    %0 = vector.load %arg2[%c0, %c0_0, %c0_1] : memref<1x9x32xf32, #tpu.memory_space<vmem>>, vector<1x1x32xf32>
    %c0_2 = arith.constant 0 : index
    %c0_3 = arith.constant 0 : index
    %c0_4 = arith.constant 0 : index
    %1 = vector.load %arg3[%c0_2, %c0_3, %c0_4] : memref<1x9x32xf32, #tpu.memory_space<vmem>>, vector<1x1x32xf32>
    tpu.vector_store %arg3[%c0_2, %c0_3, %c0_4], %0 {strides = array<i32>} : memref<1x9x32xf32, #tpu.memory_space<vmem>>, vector<1x1x32xf32>,
    %c0_5 = arith.constant 0 : index
    %c0_6 = arith.constant 0 : index
    %c0_7 = arith.constant 0 : index
    %2 = vector.load %arg1[%c0_5, %c0_6, %c0_7] : memref<1x8x32xf32, #tpu.memory_space<vmem>>, vector<1x8x32xf32>
    %c0_8 = arith.constant 0 : index
    %c1 = arith.constant 1 : index
    %c0_9 = arith.constant 0 : index
    %3 = vector.load %arg2[%c0_8, %c1, %c0_9] : memref<1x9x32xf32, #tpu.memory_space<vmem>>, vector<1x8x32xf32>
    %4 = arith.addf %2, %3 : vector<1x8x32xf32>
    %c0_10 = arith.constant 0 : index
    %c1_11 = arith.constant 1 : index
    %c0_12 = arith.constant 0 : index
    %5 = vector.load %arg3[%c0_10, %c1_11, %c0_12] : memref<1x9x32xf32, #tpu.memory_space<vmem>>, vector<1x8x32xf32>
    tpu.vector_store %arg3[%c0_10, %c1_11, %c0_12], %4 {strides = array<i32>} : memref<1x9x32xf32, #tpu.memory_space<vmem>>, vector<1x8x32xf32>,
    return
  }
  func.func @transform_0(%arg0: i32) -> (i32, i32, i32) {
    %c0_i32 = arith.constant 0 : i32
    %c0_i32_0 = arith.constant 0 : i32
    %c0_i32_1 = arith.constant 0 : i32
    return %arg0, %c0_i32, %c0_i32_0 : i32, i32, i32
  }
  func.func @transform_1(%arg0: i32) -> (i32, i32, i32) {
    %c0_i32 = arith.constant 0 : i32
    %c0_i32_0 = arith.constant 0 : i32
    %c0_i32_1 = arith.constant 0 : i32
    %c0_i32_2 = arith.constant 0 : i32
    return %c0_i32, %c0_i32_0, %c0_i32_1 : i32, i32, i32
  }
  func.func @transform_2(%arg0: i32) -> (i32, i32, i32) {
    %c0_i32 = arith.constant 0 : i32
    %c0_i32_0 = arith.constant 0 : i32
    %c0_i32_1 = arith.constant 0 : i32
    return %arg0, %c0_i32, %c0_i32_0 : i32, i32, i32
  }
}

</mosaic_0001>

<bundles_post_ra>
// kernel: tpu_custom_call.1
= control target key start
LH: loop header
LB: loop body
LE: loop exit
PB: predicated region body
PF: predicated region fallthrough
CT: control target
= control target key end

     0   :  { %s227_s9 = smov 0   ;;  %s258_s0 = inlined_call_operand.vmem [shape: f32[2,8,32], index: 0, kind: input, shape index: {}]   ;;  %s259_s1 = inlined_call_operand.vmem [shape: f32[1,9,32], index: 1, kind: input, shape index: {}]   ;;  %s260_s2 = inlined_call_operand.vmem [shape: f32[2,9,32], index: 2, kind: output, shape index: {}]  }
   0x1 LB: > { %s204_s10 = sadd.s32 4294967295, %s229_s9   ;;  %p208_p0 = scmp.ge.s32.totalorder %s229_s9, 1  ;;  %s229_s9 = sphi %s227_s9, %s12_s9  }
   0x2   : > { %p111_p1 = scmp.lt.s32.totalorder %s229_s9, 3 }
   0x4   : > { %p112_p2 = pnand %p208_p0, %p111_p1 }
   0x5   : > { %p132_p3 = scmp.lt.s32.totalorder (!%p112_p2), %s204_s10, 1  ;;  %v141_v0 = vld [vmem:[%s259_s1] sm:$0x1] (!%p112_p2)  ;;  %vm142_vm0 = vcmask (!%p112_p2), 253952   ;;  %v145_v1 = vld [vmem:[%s259_s1 + $0x1] sm:$0xff] (!%p112_p2)  ;;  %vm147_vm1 = vcmask (!%p112_p2), 261120  }
   0x6   : > { %115 = sbr.rel (%p112_p2) target bundleno = 20 (0x14), region = 28 }
   0xd   : > { %s262_s10 = smov (!%p132_p3, %s204_s10), 1 }
   0xe   : > { %s214_s13 = sshll.u32 %s262_s10, 4  ;;  %s209_s14 = sshll.u32 %s262_s10, 3 }
   0xf   : > { %s140_s19 = scalar_lea.vmem %s260_s2, %s214_s13  ;;  %s135_s22 = scalar_lea.vmem %s258_s0, %s209_s14 }
  0x10   : > { %143 = vst.msk [vmem:[%s140_s19] sm:$0x1] %vm142_vm0, %v141_v0  ;;  %v144_v2 = vld [vmem:[%s135_s22] sm:$0xff] }
  0x11   : > { %v146_v3 = vadd.f32 %v145_v1, %v144_v2 }
  0x13   : > { %148 = vst.msk [vmem:[%s140_s19 + $0x1] sm:$0xff] %vm147_vm1, %v146_v3 }
  0x14 PF: > { %s12_s9 = sadd.s32 1, %s229_s9  }
  0x15   : > { %p9_p4 = scmp.ge.s32.totalorder %s12_s9, 4  }
  0x17   :  { %11 = sbr.rel (!%p9_p4) target bundleno = 1 (0x1), region = 58 }

</bundles_post_ra>
